<compile_context>
chip_gen: v5e
topology: v5e:2x2
jax: 0.10.0
libtpu: 0.0.40
codegen_flags: <defaults>
</compile_context>

<pallas_src>
import math

import jax
import jax.numpy as jnp
from jax.experimental import pallas as pl
from jax.experimental.pallas import tpu as pltpu


_LANE = 128       # vreg lane width
_MAX_FEAT_TILE = 512


def _round_up(n: int, m: int) -> int:
    return ((n + m - 1) // m) * m


def _vmem_capacity_bytes() -> int:
    """Physical VMEM per core; conservative fallback if the query fails."""
    try:
        info = pltpu.get_tpu_info()
        for attr in ("vmem_capacity_bytes", "vmem_size_bytes"):
            v = getattr(info, attr, None)
            if v:
                return int(v)
    except Exception:
        pass
    return 64 * 1024 * 1024  # v7x per-TC size (smallest current chip)


def _feature_tiles(d_in: int, d_out: int):
    """Deterministic (K, N) padding + tile sizes from the layer shape."""
    d_in_pad = _round_up(max(d_in, _LANE), _LANE)
    tk = math.gcd(d_in_pad, _MAX_FEAT_TILE)        # multiple of 128, divides K_pad
    if d_out < _LANE:
        # Tiny head: keep true width (full-extent last dim). The masked store
        # is cheaper than 128/d_out write amplification + post-slice copy.
        o_pad, tn = d_out, d_out
    else:
        o_pad = _round_up(d_out, _LANE)
        tn = math.gcd(o_pad, _MAX_FEAT_TILE)        # multiple of 128, divides O_pad
    return d_in_pad, tk, o_pad, tn


def _linear_kernel(x_ref, w_ref, b_ref, o_ref, acc_ref):
    """One (tb, tn) output tile; K streamed over the last grid axis."""
    k = pl.program_id(2)

    @pl.when(k == 0)
    def _init():
        acc_ref[...] = jnp.zeros_like(acc_ref)

    # Cast x tile to the weight dtype on the VPU (hidden under MXU compute).
    acc_ref[...] += jnp.dot(
        x_ref[...].astype(w_ref.dtype), w_ref[...],
        preferred_element_type=jnp.float32)

    @pl.when(k == pl.num_programs(2) - 1)
    def _finalize():
        o_ref[...] = (acc_ref[...] + b_ref[...]).astype(o_ref.dtype)


def prepare_meta_linear(weight, bias, *, compute_dtype=jnp.bfloat16):
    """Pre-transpose / pad / cast the parameters once (hoist out of hot path).

    weight: [D_out, D_in] (PyTorch layout), bias: [D_out]
    Returns (w_t [K_pad, O_pad] compute_dtype, b2 [1, O_pad] f32).
    """
    d_out, d_in = weight.shape
    d_in_pad, _, o_pad, _ = _feature_tiles(d_in, d_out)
    w_t = jnp.zeros((d_in_pad, o_pad), compute_dtype)
    w_t = w_t.at[:d_in, :d_out].set(weight.T.astype(compute_dtype))
    b2 = jnp.zeros((1, o_pad), jnp.float32)
    b2 = b2.at[:, :d_out].set(bias.astype(jnp.float32))
    return w_t, b2


def meta_linear_apply(x, w_t, b2, d_out, *, tb=None, out_dtype=None):
    """y = x @ W.T + b with pre-prepared (w_t, b2) from prepare_meta_linear."""
    out_dtype = out_dtype or x.dtype
    *lead, d_in = x.shape
    d_in_pad, tk, o_pad, tn = _feature_tiles(d_in, d_out)
    assert w_t.shape == (d_in_pad, o_pad), (w_t.shape, d_in_pad, o_pad)
    assert b2.shape == (1, o_pad)

    b_total = 1
    for s in lead:
        b_total *= s
    x2 = x.reshape(b_total, d_in)
    if d_in_pad != d_in:  # zero cols don't change the result (W rows also zero)
        x2 = jnp.pad(x2, ((0, 0), (0, d_in_pad - d_in)))

    cap = _vmem_capacity_bytes()
    budget = int(cap * 0.60)          # tile-selection budget (headroom for Mosaic)

    if tb is None:
        tb = 1024 if cap >= (100 << 20) else 512   # v5e/v6e: 128 MiB; v7x: 64 MiB
    tb = max(16, _round_up(int(tb), 16))           # bf16 sublane packing / MXU feed
    tb = min(tb, _round_up(b_total, 16))

    x_item = jnp.dtype(x2.dtype).itemsize
    w_item = jnp.dtype(w_t.dtype).itemsize
    o_item = jnp.dtype(out_dtype).itemsize

    def _vmem_needed(tb_):
        return (2 * tb_ * tk * x_item        # x tiles (double-buffered)
                + 2 * tk * tn * w_item       # W tiles (double-buffered)
                + 2 * max(tn, _LANE) * 4     # bias tile
                + 2 * tb_ * tn * o_item      # out tiles (double-buffered)
                + tb_ * tn * 4)              # f32 accumulator scratch

    while tb > 16 and _vmem_needed(tb) > budget:
        tb = max(16, _round_up(tb // 2, 16))

    b_padded = _round_up(b_total, tb)
    if b_padded != b_total:
        x2 = jnp.pad(x2, ((0, b_padded - b_total), (0, 0)))

    grid = (b_padded // tb, o_pad // tn, d_in_pad // tk)

    vmem_limit = int(min(cap * 0.90, max(2 * _vmem_needed(tb), 8 << 20)))

    cost = pl.CostEstimate(
        flops=2 * b_total * d_in * d_out,
        transcendentals=0,
        bytes_accessed=(b_total * d_in * x_item + d_in * d_out * w_item
                        + d_out * 4 + b_total * d_out * o_item))

    out = pl.pallas_call(
        _linear_kernel,
        out_shape=jax.ShapeDtypeStruct((b_padded, o_pad), out_dtype),
        grid=grid,
        in_specs=[
            pl.BlockSpec((tb, tk), lambda i, j, k: (i, k)),   # x
            pl.BlockSpec((tk, tn), lambda i, j, k: (k, j)),   # W (streamed)
            pl.BlockSpec((1, tn), lambda i, j, k: (0, j)),    # bias
        ],
        out_specs=pl.BlockSpec((tb, tn), lambda i, j, k: (i, j)),
        scratch_shapes=[pltpu.VMEM((tb, tn), jnp.float32)],
        compiler_params=pltpu.CompilerParams(
            dimension_semantics=("parallel", "parallel", "arbitrary"),
            vmem_limit_bytes=vmem_limit,
        ),
        cost_estimate=cost,
    )(x2, w_t, b2)

    out = out[:b_total, :d_out]
    return out.reshape(*lead, d_out)


def meta_linear_forward(x, weight, bias, *, compute_dtype=jnp.bfloat16,
                        tb=None, out_dtype=None):
    """Convenience wrapper: prep + apply. For repeated calls with the same
    parameters, call prepare_meta_linear() once and reuse its outputs."""
    d_out = weight.shape[0]
    w_t, b2 = prepare_meta_linear(weight, bias, compute_dtype=compute_dtype)
    return meta_linear_apply(x, w_t, b2, d_out, tb=tb, out_dtype=out_dtype)


if __name__ == "__main__":
    key = jax.random.PRNGKey(0)
    kx, kw, kb, kx2, kw2, kb2 = jax.random.split(key, 6)

    # --- 1) Small MetaLinear head (d_out < 128, single grid step), f32 path.
    B, D_IN, D_OUT = 8, 32, 16
    bound = 1.0 / math.sqrt(D_IN)
    x = jax.random.normal(kx, (B, D_IN), jnp.float32)
    weight = jax.random.uniform(kw, (D_OUT, D_IN), jnp.float32, -bound, bound)
    bias = jax.random.uniform(kb, (D_OUT,), jnp.float32, -bound, bound)
    ref = x @ weight.T + bias

    out_f32 = jax.block_until_ready(
        meta_linear_forward(x, weight, bias, compute_dtype=jnp.float32))
    assert out_f32.shape == (B, D_OUT)
    assert jnp.allclose(out_f32, ref, atol=1e-4, rtol=1e-4)

    # --- 2) Multi-tile M/N/K grid with leading batch dims, default bf16 path.
    #     d_in=640 -> K_pad=640, tk=128 (5 K steps); d_out=384 -> tn=128 (3 N
    #     steps); b_total=40 with tb=16 -> 3 batch steps.
    LEAD, SEQ, D_IN2, D_OUT2 = 2, 20, 640, 384
    bound2 = 1.0 / math.sqrt(D_IN2)
    x2 = jax.random.normal(kx2, (LEAD, SEQ, D_IN2), jnp.float32)
    weight2 = jax.random.uniform(kw2, (D_OUT2, D_IN2), jnp.float32, -bound2, bound2)
    bias2 = jax.random.uniform(kb2, (D_OUT2,), jnp.float32, -bound2, bound2)
    ref2 = x2 @ weight2.T + bias2

    w_t2, b2_2 = prepare_meta_linear(weight2, bias2)          # hoisted prep
    out_bf16 = jax.block_until_ready(
        meta_linear_apply(x2, w_t2, b2_2, D_OUT2, tb=16))
    assert out_bf16.shape == (LEAD, SEQ, D_OUT2)
    assert jnp.allclose(out_bf16, ref2, atol=5e-2, rtol=5e-2)

    print("KERNEL_OK")
</pallas_src>

<mosaic_0001>
module attributes {stable_mosaic.version = 11 : i64} {
  func.func @_linear_kernel(%arg0: i32, %arg1: i32, %arg2: i32, %arg3: memref<16x128xf32, #tpu.memory_space<vmem>>, %arg4: memref<128x16xf32, #tpu.memory_space<vmem>>, %arg5: memref<1x16xf32, #tpu.memory_space<vmem>>, %arg6: memref<16x16xf32, #tpu.memory_space<vmem>>, %arg7: memref<16x16xf32, #tpu.memory_space<vmem>>) attributes {dimension_semantics = [#tpu.dimension_semantics<parallel>, #tpu.dimension_semantics<parallel>, #tpu.dimension_semantics<arbitrary>], iteration_bounds = array<i64: 1, 1, 1>, scalar_prefetch = 0 : i64, scratch_operands = 1 : i64, tpu.core_type = #tpu.core_type<tc>, window_params = [{transform_indices = @transform_0, window_bounds = array<i64: 16, 128>}, {transform_indices = @transform_1, window_bounds = array<i64: 128, 16>}, {transform_indices = @transform_2, window_bounds = array<i64: 1, 16>}, {transform_indices = @transform_3, window_bounds = array<i64: 16, 16>}]} {
    %c0_i32 = arith.constant 0 : i32
    %0 = arith.cmpi eq, %arg2, %c0_i32 : i32
    %1 = arith.extui %0 : i1 to i32
    %c0_i32_0 = arith.constant 0 : i32
    %2 = arith.cmpi ne, %1, %c0_i32_0 : i32
    scf.if %2 {
      %cst_10 = arith.constant 0.000000e+00 : f32
      %12 = vector.broadcast %cst_10 : f32 to vector<16x16xf32>
      %c0_11 = arith.constant 0 : index
      %c0_12 = arith.constant 0 : index
      %13 = vector.load %arg7[%c0_11, %c0_12] : memref<16x16xf32, #tpu.memory_space<vmem>>, vector<16x16xf32>
      tpu.vector_store %arg7[%c0_11, %c0_12], %12 {strides = array<i32>} : memref<16x16xf32, #tpu.memory_space<vmem>>, vector<16x16xf32>,
    } else {
    }
    %c0 = arith.constant 0 : index
    %c0_1 = arith.constant 0 : index
    %3 = vector.load %arg7[%c0, %c0_1] : memref<16x16xf32, #tpu.memory_space<vmem>>, vector<16x16xf32>
    %c0_2 = arith.constant 0 : index
    %c0_3 = arith.constant 0 : index
    %4 = vector.load %arg3[%c0_2, %c0_3] : memref<16x128xf32, #tpu.memory_space<vmem>>, vector<16x128xf32>
    %c0_4 = arith.constant 0 : index
    %c0_5 = arith.constant 0 : index
    %5 = vector.load %arg4[%c0_4, %c0_5] : memref<128x16xf32, #tpu.memory_space<vmem>>, vector<128x16xf32>
    %cst = arith.constant dense<0.000000e+00> : vector<16x16xf32>
    %6 = tpu.matmul %4, %5, %cst {dimension_numbers = #tpu.dot_dimension_numbers<[1], [0], [0], [1], [0, 0, 1, 1], [], []>} : vector<16x128xf32>, vector<128x16xf32>, vector<16x16xf32> -> vector<16x16xf32>
    %7 = arith.addf %3, %6 : vector<16x16xf32>
    %c0_6 = arith.constant 0 : index
    %c0_7 = arith.constant 0 : index
    %8 = vector.load %arg7[%c0_6, %c0_7] : memref<16x16xf32, #tpu.memory_space<vmem>>, vector<16x16xf32>
    tpu.vector_store %arg7[%c0_6, %c0_7], %7 {strides = array<i32>} : memref<16x16xf32, #tpu.memory_space<vmem>>, vector<16x16xf32>,
    %c0_i32_8 = arith.constant 0 : i32
    %9 = arith.cmpi eq, %arg2, %c0_i32_8 : i32
    %10 = arith.extui %9 : i1 to i32
    %c0_i32_9 = arith.constant 0 : i32
    %11 = arith.cmpi ne, %10, %c0_i32_9 : i32
    scf.if %11 {
      %c0_10 = arith.constant 0 : index
      %c0_11 = arith.constant 0 : index
      %12 = vector.load %arg7[%c0_10, %c0_11] : memref<16x16xf32, #tpu.memory_space<vmem>>, vector<16x16xf32>
      %c0_12 = arith.constant 0 : index
      %c0_13 = arith.constant 0 : index
      %13 = vector.load %arg5[%c0_12, %c0_13] : memref<1x16xf32, #tpu.memory_space<vmem>>, vector<1x16xf32>
      %14 = vector.broadcast %13 : vector<1x16xf32> to vector<16x16xf32>
      %15 = arith.addf %12, %14 : vector<16x16xf32>
      %c0_14 = arith.constant 0 : index
      %c0_15 = arith.constant 0 : index
      %16 = vector.load %arg6[%c0_14, %c0_15] : memref<16x16xf32, #tpu.memory_space<vmem>>, vector<16x16xf32>
      tpu.vector_store %arg6[%c0_14, %c0_15], %15 {strides = array<i32>} : memref<16x16xf32, #tpu.memory_space<vmem>>, vector<16x16xf32>,
    } else {
    }
    return
  }
  func.func @transform_0(%arg0: i32, %arg1: i32, %arg2: i32) -> (i32, i32) {
    %c0_i32 = arith.constant 0 : i32
    return %arg0, %arg2 : i32, i32
  }
  func.func @transform_1(%arg0: i32, %arg1: i32, %arg2: i32) -> (i32, i32) {
    %c0_i32 = arith.constant 0 : i32
    return %arg2, %arg1 : i32, i32
  }
  func.func @transform_2(%arg0: i32, %arg1: i32, %arg2: i32) -> (i32, i32) {
    %c0_i32 = arith.constant 0 : i32
    %c0_i32_0 = arith.constant 0 : i32
    return %c0_i32, %arg1 : i32, i32
  }
  func.func @transform_3(%arg0: i32, %arg1: i32, %arg2: i32) -> (i32, i32) {
    %c0_i32 = arith.constant 0 : i32
    return %arg0, %arg1 : i32, i32
  }
}

</mosaic_0001>

<bundles_post_ra>
// kernel: tpu_custom_call.1
= control target key start
LH: loop header
LB: loop body
LE: loop exit
PB: predicated region body
PF: predicated region fallthrough
CT: control target
= control target key end

     0   :  { %vm19_vm0 = vcmask 130048   ;;  %v148_v2 = vmov 0.0   ;;  %s238_s0 = inlined_call_operand.vmem [shape: f32[16,128], index: 0, kind: input, shape index: {}]   ;;  %s239_s1 = inlined_call_operand.vmem [shape: f32[128,16], index: 1, kind: input, shape index: {}]   ;;  %s240_s2 = inlined_call_operand.vmem [shape: f32[1,16], index: 2, kind: input, shape index: {}]   ;;  %s241_s3 = inlined_call_operand.hbm [shape: f32[16,16], index: 3, kind: output, shape index: {}]  }
   0x1   :  { %v41_v0 = vld [vmem:[%s239_s1 + $0x78] sm:$0xff]  ;;  %v40_v1 = vld [vmem:[%s239_s1 + $0x70] sm:$0xff]  ;;  %20 = vst.msk [vmem:[#allocation2] sm:$0xff] %vm19_vm0, %v148_v2  ;;  %v39_v3 = vld [vmem:[%s239_s1 + $0x68] sm:$0xff] }
   0x2   :  { %42 = vmatpush.msra.mxu0 %v41_v0  ;;  %101 = vmatpush.msra.mxu1 %v41_v0  ;;  %21 = vst.msk [vmem:[#allocation2 + $0x8] sm:$0xff] %vm19_vm0, %v148_v2  ;;  %v38_v4 = vld [vmem:[%s239_s1 + $0x60] sm:$0xff]  ;;  %v37_v5 = vld [vmem:[%s239_s1 + $0x58] sm:$0xff] }
   0x4   :  { %43 = vmatpush.msra.mxu0 %v40_v1  ;;  %102 = vmatpush.msra.mxu1 %v40_v1 }
   0x6   :  { %44 = vmatpush.msra.mxu0 %v39_v3  ;;  %103 = vmatpush.msra.mxu1 %v39_v3 }
   0x7   :  { %8 = vsyncpa [#allocation4], 0  ;;  %v36_v6 = vld [vmem:[%s239_s1 + $0x50] sm:$0xff]  ;;  %v35_v7 = vld [vmem:[%s239_s1 + $0x48] sm:$0xff]  ;;  %s149_s22 = smov [#allocation3]   ;;  %s89_s25 = sshll.u32 %s241_s3, 4  ;;  %s90_s25 = int_to_ptr.hbm [resolvable:$true] %s89_s25 }
   0x8   :  { %45 = vmatpush.msra.mxu0 %v38_v4  ;;  %104 = vmatpush.msra.mxu1 %v38_v4  ;;  %v34_v8 = vld [vmem:[%s239_s1 + $0x40] sm:$0xff]  ;;  %v33_v9 = vld [vmem:[%s239_s1 + $0x38] sm:$0xff]  ;;  %v32_v10 = vld [vmem:[%s239_s1 + $0x30] sm:$0xff]  ;;  %s150_s26 = smov 128   ;;  %s151_s27 = smov 8  }
   0x9   :  { %v31_v11 = vld [vmem:[%s239_s1 + $0x28] sm:$0xff]  ;;  %v30_v12 = vld [vmem:[%s239_s1 + $0x20] sm:$0xff]  ;;  %v29_v13 = vld [vmem:[%s239_s1 + $0x18] sm:$0xff] }
   0xa   :  { %46 = vmatpush.msra.mxu0 %v37_v5  ;;  %105 = vmatpush.msra.mxu1 %v37_v5  ;;  %v28_v14 = vld [vmem:[%s239_s1 + $0x10] sm:$0xff]  ;;  %v27_v15 = vld [vmem:[%s239_s1 + $0x8] sm:$0xff]  ;;  %v26_v16 = vld [vmem:[%s239_s1] sm:$0xff] }
   0xb   :  { %v24_v17 = vld [vmem:[%s238_s0] sm:$0xff]  ;;  %v25_v18 = vld [vmem:[%s238_s0 + $0x8] sm:$0xff]  ;;  %s87_s0 = sshll.u32 %s149_s22, 4  ;;  %s88_s0 = int_to_ptr.vmem [resolvable:$true] %s87_s0 }
   0xc   :  { %47 = vmatpush.msra.mxu0 %v36_v6  ;;  %106 = vmatpush.msra.mxu1 %v36_v6  ;;  %v22_v19 = vld [vmem:[#allocation2] sm:$0xff]  ;;  %v23_v20 = vld [vmem:[#allocation2 + $0x8] sm:$0xff] }
   0xd   :  { %v121_v25 = vld [vmem:[%s240_s2] ss:$0 sm:$0xff] }
   0xe   :  { %48 = vmatpush.msra.mxu0 %v35_v7  ;;  %107 = vmatpush.msra.mxu1 %v35_v7 }
  0x10   :  { %49 = vmatpush.msra.mxu0 %v34_v8  ;;  %108 = vmatpush.msra.mxu1 %v34_v8 }
  0x12   :  { %50 = vmatpush.msra.mxu0 %v33_v9  ;;  %109 = vmatpush.msra.mxu1 %v33_v9 }
  0x14   :  { %51 = vmatpush.msra.mxu0 %v32_v10  ;;  %110 = vmatpush.msra.mxu1 %v32_v10 }
  0x16   :  { %52 = vmatpush.msra.mxu0 %v31_v11  ;;  %111 = vmatpush.msra.mxu1 %v31_v11 }
  0x18   :  { %53 = vmatpush.msra.mxu0 %v30_v12  ;;  %112 = vmatpush.msra.mxu1 %v30_v12 }
  0x1a   :  { %54 = vmatpush.msra.mxu0 %v29_v13  ;;  %113 = vmatpush.msra.mxu1 %v29_v13 }
  0x1c   :  { %55 = vmatpush.msra.mxu0 %v28_v14  ;;  %114 = vmatpush.msra.mxu1 %v28_v14 }
  0x1e   :  { %56 = vmatpush.msra.mxu0 %v27_v15  ;;  %115 = vmatpush.msra.mxu1 %v27_v15 }
  0x20   :  { %57 = vmatpush.msra.mxu0 %v26_v16  ;;  %116 = vmatpush.msra.mxu1 %v26_v16 }
  0x21   :  { %58 = vmatmul.f32.vlgmr.msra.gmra.mxu0 %v24_v17  ;;  %61 = vmatmul.f32.vlgmr.msra.gmra.mxu1 %v25_v18 }
  0x9e   :  { %v59_v21 = vpop.f32.mrf.mxu0  ;;  %v62_v22 = vpop.f32.mrf.mxu1 }
  0x9f   :  { %v65_v23 = vadd.f32 %v59_v21, %v22_v19  ;;  %v66_v24 = vadd.f32 %v62_v22, %v23_v20 }
  0xa1   :  { %68 = vst.msk [vmem:[#allocation2] sm:$0xff] %vm19_vm0, %v65_v23 }
  0xa2   :  { %69 = vst.msk [vmem:[#allocation2 + $0x8] sm:$0xff] %vm19_vm0, %v66_v24 }
  0xa8   :  { %v73_v26 = vld [vmem:[#allocation2] sm:$0xff] }
  0xa9   :  { %v74_v27 = vld [vmem:[#allocation2 + $0x8] sm:$0xff]  ;;  %v79_v28 = vadd.f32 %v121_v25, %v73_v26 }
  0xaa   :  { %v80_v29 = vadd.f32 %v121_v25, %v74_v27 }
  0xab   :  { %81 = vst.msk [vmem:[#allocation3] sm:$0xff] %vm19_vm0, %v79_v28 }
  0xac   :  { %82 = vst.msk [vmem:[#allocation3 + $0x8] sm:$0xff] %vm19_vm0, %v80_v29 }
  0xad   :  { %95 = dma.vmem_to_hbm [thread:$0]  %s88_s0, 256, %s90_s25, [#allocation4], %s150_s26, %s150_s26, %s151_s27  }
  0xae   :  { %146 = dma.done.wait [#allocation4], 256  }
  0xaf   :  { %147 = vsyncadd [#allocation4], 4294967040 }
  0xb0   :  { %100 = vsyncpa [#allocation4], 1 }

</bundles_post_ra>
